<compile_context>
chip_gen: v6e
topology: v6e:2x2x1
jax: 0.10.0
libtpu: 0.0.40
codegen_flags: <defaults>
</compile_context>

<pallas_src>
import functools

import jax
import jax.numpy as jnp
from jax import lax
from jax.experimental import pallas as pl
from jax.experimental.pallas import tpu as pltpu

BN_EPS = 1e-5


def _fc_bn_relu_drop_kernel(x_ref, wt_ref, p_ref, bits_ref, o_ref, *,
                            dropout_rate, apply_dropout):
    # ---- Linear: y = x @ Wt + b  (bf16 operands, f32 accumulation on the MXU) ----
    x = x_ref[...].astype(jnp.bfloat16)
    wt = wt_ref[...].astype(jnp.bfloat16)
    params = p_ref[...]                       # (3, TN) f32: rows = [bias, gamma, beta]
    bias, gamma, beta = params[0:1], params[1:2], params[2:3]

    y = jnp.dot(x, wt, preferred_element_type=jnp.float32) + bias

    # ---- BatchNorm1d, training mode: biased batch statistics over the batch axis.
    # Stats are per-feature, so computing them per N tile is exact.
    mean = jnp.mean(y, axis=0, keepdims=True)
    var = jnp.mean(jnp.square(y - mean), axis=0, keepdims=True)
    out = gamma * (y - mean) * lax.rsqrt(var + BN_EPS) + beta

    # ---- ReLU ----
    out = jnp.maximum(out, 0.0)

    # ---- Dropout (inverted): integer-threshold compare on precomputed u32 bits ----
    if apply_dropout and dropout_rate > 0.0:
        thresh = min(int(round(dropout_rate * 4294967296.0)), 4294967295)
        keep = bits_ref[...] >= jnp.uint32(thresh)
        out = jnp.where(keep, out * (1.0 / (1.0 - dropout_rate)), 0.0)

    o_ref[...] = out.astype(o_ref.dtype)


def fully_connected_forward(x, wt, params, rng_key, *, dropout_rate,
                            training=True):
    """Fused Linear -> BatchNorm1d(train batch stats) -> ReLU -> Dropout.

    x:      (B, C)  f32
    wt:     (C, N)  f32   Linear weight stored pre-transposed (= torch W.T)
    params: (3, N)  f32   rows are [linear bias, bn weight (gamma), bn bias (beta)]
    """
    B, C = x.shape
    N = wt.shape[1]

    apply_dropout = bool(training) and float(dropout_rate) > 0.0
    if apply_dropout:
        bits = jax.random.bits(rng_key, (B, N), dtype=jnp.uint32)
    else:
        bits = jnp.zeros((B, N), dtype=jnp.uint32)

    # Feature-axis tiling: TN a multiple of 128 keeps the output lane-dense and lets
    # BlockSpec double-buffer the weight tiles. Falls back to a single full tile if
    # N is not 128-aligned (full-array dims are always legal block dims).
    if N % 128 == 0:
        tn = min(N, 512)
        while N % tn != 0:
            tn -= 128
    else:
        tn = N
    grid_n = N // tn

    kernel = functools.partial(_fc_bn_relu_drop_kernel,
                               dropout_rate=float(dropout_rate),
                               apply_dropout=apply_dropout)

    return pl.pallas_call(
        kernel,
        out_shape=jax.ShapeDtypeStruct((B, N), jnp.float32),
        grid_spec=pltpu.PrefetchScalarGridSpec(
            num_scalar_prefetch=0,
            grid=(grid_n,),
            in_specs=[
                pl.BlockSpec((B, C), lambda j: (0, 0)),    # x: same block every tile
                pl.BlockSpec((C, tn), lambda j: (0, j)),   # weight slice
                pl.BlockSpec((3, tn), lambda j: (0, j)),   # packed bias/gamma/beta
                pl.BlockSpec((B, tn), lambda j: (0, j)),   # dropout random bits
            ],
            out_specs=pl.BlockSpec((B, tn), lambda j: (0, j)),
        ),
        compiler_params=pltpu.CompilerParams(
            dimension_semantics=("parallel",)),
    )(x, wt, params, bits)


if __name__ == "__main__":
    # Small shapes consistent with the module: batch=8, inchannel=32, num_neurons=128
    B, C_IN, N_NEURONS = 8, 32, 128
    DROPOUT_RATE = 0.25

    key = jax.random.PRNGKey(0)
    kx, kw, kb, kd = jax.random.split(key, 4)

    x = jax.random.normal(kx, (B, C_IN), dtype=jnp.float32)

    # Deterministic parameter init; weight stored pre-transposed as (C_in, N).
    bound = 1.0 / (C_IN ** 0.5)
    wt = jax.random.uniform(kw, (C_IN, N_NEURONS), minval=-bound, maxval=bound,
                            dtype=jnp.float32)
    b = jax.random.uniform(kb, (N_NEURONS,), minval=-bound, maxval=bound,
                           dtype=jnp.float32)
    gamma = jnp.ones((N_NEURONS,), dtype=jnp.float32)   # BatchNorm1d weight init
    beta = jnp.zeros((N_NEURONS,), dtype=jnp.float32)   # BatchNorm1d bias init
    params = jnp.stack([b, gamma, beta], axis=0)        # packed once, (3, N)

    out = fully_connected_forward(x, wt, params, kd,
                                  dropout_rate=DROPOUT_RATE, training=True)
    jax.block_until_ready(out)

    # Sanity check of the deterministic part (linear + bn + relu, dropout off)
    # against pure JAX with the same bf16-operand / f32-accumulate matmul.
    out_eval = fully_connected_forward(x, wt, params, kd,
                                       dropout_rate=DROPOUT_RATE, training=False)
    y_ref = jnp.dot(x.astype(jnp.bfloat16), wt.astype(jnp.bfloat16),
                    preferred_element_type=jnp.float32) + b
    mean = jnp.mean(y_ref, axis=0, keepdims=True)
    var = jnp.mean((y_ref - mean) ** 2, axis=0, keepdims=True)
    ref = jnp.maximum(gamma * (y_ref - mean) / jnp.sqrt(var + BN_EPS) + beta, 0.0)
    assert jnp.allclose(out_eval, ref, atol=1e-2, rtol=1e-2), "mismatch vs reference"

    print("KERNEL_OK")
</pallas_src>

<mosaic_0001>
module attributes {stable_mosaic.version = 11 : i64} {
  func.func @_fc_bn_relu_drop_kernel(%arg0: i32, %arg1: memref<8x32xf32, #tpu.memory_space<vmem>>, %arg2: memref<32x128xf32, #tpu.memory_space<vmem>>, %arg3: memref<3x128xf32, #tpu.memory_space<vmem>>, %arg4: memref<8x128xi32, #tpu.memory_space<vmem>>, %arg5: memref<8x128xf32, #tpu.memory_space<vmem>>) attributes {dimension_semantics = [#tpu.dimension_semantics<parallel>], iteration_bounds = array<i64: 1>, scalar_prefetch = 0 : i64, scratch_operands = 0 : i64, tpu.core_type = #tpu.core_type<tc>, window_params = [{pipeline_mode = #tpu.pipeline_mode<synchronous>, transform_indices = @transform_0, window_bounds = array<i64: 8, 32>}, {transform_indices = @transform_1, window_bounds = array<i64: 32, 128>}, {transform_indices = @transform_2, window_bounds = array<i64: 3, 128>}, {transform_indices = @transform_3, window_bounds = array<i64: 8, 128>}, {transform_indices = @transform_4, window_bounds = array<i64: 8, 128>}]} {
    %c0 = arith.constant 0 : index
    %c0_0 = arith.constant 0 : index
    %0 = vector.load %arg1[%c0, %c0_0] : memref<8x32xf32, #tpu.memory_space<vmem>>, vector<8x32xf32>
    %1 = arith.truncf %0 : vector<8x32xf32> to vector<8x32xbf16>
    %c0_1 = arith.constant 0 : index
    %c0_2 = arith.constant 0 : index
    %2 = vector.load %arg2[%c0_1, %c0_2] : memref<32x128xf32, #tpu.memory_space<vmem>>, vector<32x128xf32>
    %3 = arith.truncf %2 : vector<32x128xf32> to vector<32x128xbf16>
    %c0_3 = arith.constant 0 : index
    %c0_4 = arith.constant 0 : index
    %4 = vector.load %arg3[%c0_3, %c0_4] : memref<3x128xf32, #tpu.memory_space<vmem>>, vector<3x128xf32>
    %5 = vector.extract_strided_slice %4 {offsets = [0, 0], sizes = [1, 128], strides = [1, 1]} : vector<3x128xf32> to vector<1x128xf32>
    %6 = vector.extract_strided_slice %4 {offsets = [1, 0], sizes = [1, 128], strides = [1, 1]} : vector<3x128xf32> to vector<1x128xf32>
    %7 = vector.extract_strided_slice %4 {offsets = [2, 0], sizes = [1, 128], strides = [1, 1]} : vector<3x128xf32> to vector<1x128xf32>
    %cst = arith.constant dense<0.000000e+00> : vector<8x128xf32>
    %8 = tpu.matmul %1, %3, %cst {dimension_numbers = #tpu.dot_dimension_numbers<[1], [0], [0], [1], [0, 0, 1, 1], [], []>} : vector<8x32xbf16>, vector<32x128xbf16>, vector<8x128xf32> -> vector<8x128xf32>
    %9 = vector.broadcast %5 : vector<1x128xf32> to vector<8x128xf32>
    %10 = arith.addf %8, %9 : vector<8x128xf32>
    %cst_5 = arith.constant dense<0.000000e+00> : vector<128xf32>
    %11 = vector.multi_reduction <add>, %10, %cst_5 [0] : vector<8x128xf32> to vector<128xf32>
    %12 = vector.shape_cast %11 : vector<128xf32> to vector<1x128xf32>
    %cst_6 = arith.constant 8.000000e+00 : f32
    %13 = vector.broadcast %cst_6 : f32 to vector<1x128xf32>
    %14 = arith.divf %12, %13 : vector<1x128xf32>
    %15 = vector.broadcast %14 : vector<1x128xf32> to vector<8x128xf32>
    %16 = arith.subf %10, %15 : vector<8x128xf32>
    %17 = arith.mulf %16, %16 : vector<8x128xf32>
    %cst_7 = arith.constant dense<0.000000e+00> : vector<128xf32>
    %18 = vector.multi_reduction <add>, %17, %cst_7 [0] : vector<8x128xf32> to vector<128xf32>
    %19 = vector.shape_cast %18 : vector<128xf32> to vector<1x128xf32>
    %cst_8 = arith.constant 8.000000e+00 : f32
    %20 = vector.broadcast %cst_8 : f32 to vector<1x128xf32>
    %21 = arith.divf %19, %20 : vector<1x128xf32>
    %22 = vector.broadcast %14 : vector<1x128xf32> to vector<8x128xf32>
    %23 = arith.subf %10, %22 : vector<8x128xf32>
    %24 = vector.broadcast %6 : vector<1x128xf32> to vector<8x128xf32>
    %25 = arith.mulf %24, %23 : vector<8x128xf32>
    %cst_9 = arith.constant 9.99999974E-6 : f32
    %26 = vector.broadcast %cst_9 : f32 to vector<1x128xf32>
    %27 = arith.addf %21, %26 : vector<1x128xf32>
    %28 = math.rsqrt %27 : vector<1x128xf32>
    %29 = vector.broadcast %28 : vector<1x128xf32> to vector<8x128xf32>
    %30 = arith.mulf %25, %29 : vector<8x128xf32>
    %31 = vector.broadcast %7 : vector<1x128xf32> to vector<8x128xf32>
    %32 = arith.addf %30, %31 : vector<8x128xf32>
    %cst_10 = arith.constant 0.000000e+00 : f32
    %33 = vector.broadcast %cst_10 : f32 to vector<8x128xf32>
    %34 = arith.maximumf %32, %33 : vector<8x128xf32>
    %c0_11 = arith.constant 0 : index
    %c0_12 = arith.constant 0 : index
    %35 = vector.load %arg4[%c0_11, %c0_12] : memref<8x128xi32, #tpu.memory_space<vmem>>, vector<8x128xi32>
    %c1073741824_i32 = arith.constant 1073741824 : i32
    %36 = vector.broadcast %c1073741824_i32 : i32 to vector<8x128xi32>
    %37 = arith.cmpi uge, %35, %36 : vector<8x128xi32>
    %cst_13 = arith.constant 1.33333337 : f32
    %38 = vector.broadcast %cst_13 : f32 to vector<8x128xf32>
    %39 = arith.mulf %34, %38 : vector<8x128xf32>
    %cst_14 = arith.constant 0.000000e+00 : f32
    %40 = vector.broadcast %cst_14 : f32 to vector<8x128xf32>
    %41 = arith.select %37, %39, %40 : vector<8x128xi1>, vector<8x128xf32>
    %c0_15 = arith.constant 0 : index
    %c0_16 = arith.constant 0 : index
    %42 = vector.load %arg5[%c0_15, %c0_16] : memref<8x128xf32, #tpu.memory_space<vmem>>, vector<8x128xf32>
    tpu.vector_store %arg5[%c0_15, %c0_16], %41 {strides = array<i32>} : memref<8x128xf32, #tpu.memory_space<vmem>>, vector<8x128xf32>,
    return
  }
  func.func @transform_0(%arg0: i32) -> (i32, i32) {
    %c0_i32 = arith.constant 0 : i32
    %c0_i32_0 = arith.constant 0 : i32
    %c0_i32_1 = arith.constant 0 : i32
    return %c0_i32, %c0_i32_0 : i32, i32
  }
  func.func @transform_1(%arg0: i32) -> (i32, i32) {
    %c0_i32 = arith.constant 0 : i32
    %c0_i32_0 = arith.constant 0 : i32
    return %c0_i32, %arg0 : i32, i32
  }
  func.func @transform_2(%arg0: i32) -> (i32, i32) {
    %c0_i32 = arith.constant 0 : i32
    %c0_i32_0 = arith.constant 0 : i32
    return %c0_i32, %arg0 : i32, i32
  }
  func.func @transform_3(%arg0: i32) -> (i32, i32) {
    %c0_i32 = arith.constant 0 : i32
    %c0_i32_0 = arith.constant 0 : i32
    return %c0_i32, %arg0 : i32, i32
  }
  func.func @transform_4(%arg0: i32) -> (i32, i32) {
    %c0_i32 = arith.constant 0 : i32
    %c0_i32_0 = arith.constant 0 : i32
    return %c0_i32, %arg0 : i32, i32
  }
}

</mosaic_0001>

<bundles_post_ra>
// kernel: tpu_custom_call.1
= control target key start
LH: loop header
LB: loop body
LE: loop exit
PB: predicated region body
PF: predicated region fallthrough
CT: control target
= control target key end

     0   :  { %9 = vsyncpa [#allocation3], 0  ;;  %s358_s0 = inlined_call_operand.hbm [shape: f32[8,32], index: 0, kind: input, shape index: {}]   ;;  %s359_s1 = inlined_call_operand.hbm [shape: f32[32,128], index: 1, kind: input, shape index: {}]   ;;  %s360_s2 = inlined_call_operand.hbm [shape: f32[3,128], index: 2, kind: input, shape index: {}]   ;;  %s361_s3 = inlined_call_operand.hbm [shape: u32[8,128], index: 3, kind: input, shape index: {}]   ;;  %s362_s4 = inlined_call_operand.hbm [shape: f32[8,128], index: 4, kind: output, shape index: {}]  }
   0x1   :  { %10 = vsyncpa [#allocation6], 0 }
   0x2   :  { %11 = vsyncpa [#allocation9], 0 }
   0x3   :  { %12 = vsyncpa [#allocation4], 0  ;;  %s309_s15 = smov [#allocation5]  }
   0x4   :  { %s28_s16 = sshll.u32 %s309_s15, 4  ;;  %s29_s16 = int_to_ptr.vmem [resolvable:$true] %s28_s16 }
   0x5   :  { %s209_s17 = scalar_lea.vmem %s29_s16, 512  ;;  %p214_p1 = scmp.lt.s32.totalorder %s29_s16, %s29_s16 }
   0x6   :  { %p210_p0 = scmp.ne.s32.totalorder %s29_s16, %s209_s17  ;;  %p215_p2 = scmp.lt.s32.totalorder %s209_s17, %s209_s17 }
   0x8   :  { %p216_p3 = por %p215_p2, %p214_p1 }
   0xa   :  { %p217_p4 = pnand %p216_p3, %p210_p0 }
   0xc   :  { %220 = shalt.err (!%p217_p4)
}
   0xd   :  { %s310_s18 = smov 128   ;;  %s311_s19 = smov 8  }
   0xe   :  { %34 = dma.hbm_to_vmem [thread:$0]  %s359_s1, 512, %s29_s16, [#allocation6], %s310_s18, %s310_s18, %s311_s19  }
   0xf   :  { %s312_s22 = smov [#allocation2]   ;;  %s313_s24 = smov [#allocation7]  }
  0x10   :  { %s19_s23 = sshll.u32 %s312_s22, 4  ;;  %s41_s25 = sshll.u32 %s313_s24, 4  ;;  %s20_s23 = int_to_ptr.vmem [resolvable:$true] %s19_s23  ;;  %s42_s25 = int_to_ptr.vmem [resolvable:$true] %s41_s25 }
  0x11   :  { %s229_s26 = scalar_lea.vmem %s20_s23, 128  ;;  %p234_p6 = scmp.lt.s32.totalorder %s20_s23, %s20_s23 }
  0x12   :  { %p230_p5 = scmp.ne.s32.totalorder %s20_s23, %s229_s26  ;;  %p235_p7 = scmp.lt.s32.totalorder %s229_s26, %s229_s26 }
  0x14   :  { %p236_p8 = por %p235_p7, %p234_p6 }
  0x16   :  { %p237_p9 = pnand %p236_p8, %p230_p5 }
  0x18   :  { %240 = shalt.err (!%p237_p9)
}
  0x19   :  { %22 = dma.hbm_to_vmem [thread:$0]  %s358_s0, 128, %s20_s23, [#allocation3]  }
  0x1a   :  { %s249_s29 = scalar_lea.vmem %s42_s25, 64  ;;  %p254_p11 = scmp.lt.s32.totalorder %s42_s25, %s42_s25 }
  0x1b   :  { %p250_p10 = scmp.ne.s32.totalorder %s42_s25, %s249_s29  ;;  %p255_p12 = scmp.lt.s32.totalorder %s249_s29, %s249_s29 }
  0x1d   :  { %p256_p13 = por %p255_p12, %p254_p11 }
  0x1f   :  { %p257_p0 = pnand %p256_p13, %p250_p10 }
  0x21   :  { %260 = shalt.err (!%p257_p0)
}
  0x22   :  { %44 = dma.hbm_to_vmem [thread:$0]  %s360_s2, 64, %s42_s25, [#allocation6]  }
  0x23   :  { %s314_s5 = smov [#allocation8]  }
  0x24   :  { %s51_s6 = sshll.u32 %s314_s5, 4  ;;  %s52_s6 = int_to_ptr.vmem [resolvable:$true] %s51_s6 }
  0x25   :  { %s269_s7 = scalar_lea.vmem %s52_s6, 128  ;;  %p274_p2 = scmp.lt.s32.totalorder %s52_s6, %s52_s6 }
  0x26   :  { %p270_p1 = scmp.ne.s32.totalorder %s52_s6, %s269_s7  ;;  %p275_p3 = scmp.lt.s32.totalorder %s269_s7, %s269_s7 }
  0x28   :  { %p276_p4 = por %p275_p3, %p274_p2 }
  0x2a   :  { %p277_p5 = pnand %p276_p4, %p270_p1 }
  0x2c   :  { %280 = shalt.err (!%p277_p5)
}
  0x2d   :  { %54 = dma.hbm_to_vmem [thread:$0]  %s361_s3, 128, %s52_s6, [#allocation9]  }
  0x2e   :  { %301 = dma.done.wait [#allocation3], 128  }
  0x2f   :  { %302 = vsyncadd [#allocation3], 4294967168 }
  0x30   :  { %303 = dma.done.wait [#allocation6], 576  }
  0x31   :  { %304 = vsyncadd [#allocation6], 4294966720 }
  0x32   :  { %305 = dma.done.wait [#allocation9], 128  }
  0x33   :  { %306 = vsyncadd [#allocation9], 4294967168  ;;  %v315_v0 = vmov 0.0   ;;  %vm316_vm0 = vmmov 0   ;;  %v72_v1 = vld [vmem:[#allocation5 + $0x10] sm:$0xff]  ;;  %v73_v2 = vld [vmem:[#allocation5 + $0x18] sm:$0xff]  ;;  %v77_v9 = vlaneseq }
  0x34   :  { %182 = vmatprep.subr.bf16.mxu0 %v315_v0  ;;  %186 = vmatprep.mubr.msk.bf16.mxu0 %vm316_vm0, %v315_v0  ;;  %v70_v3 = vld [vmem:[#allocation5] sm:$0xff]  ;;  %v75_v4 = vpack.c.bf16 %v73_v2, %v72_v1  ;;  %v71_v5 = vld [vmem:[#allocation5 + $0x8] sm:$0xff]  ;;  %v68_v7 = vld [vmem:[#allocation2] sm:$0xff]  ;;  %vm81_vm1 = vcmask 261120   ;;  %s317_s2 = smov [#allocation10]  }
  0x35   :  { %v74_v6 = vpack.c.bf16 %v71_v5, %v70_v3  ;;  %v69_v8 = vpack.c.bf16 %v68_v7, %v68_v7  ;;  %v78_v10 = vshrl.u32 %v77_v9, 7  ;;  %v76_v12 = vld [vmem:[#allocation7] sm:$0x7]  ;;  %v156_v44 = vld [vmem:[#allocation8] sm:$0xff]  ;;  %s167_s3 = sshll.u32 %s317_s2, 4  ;;  %s168_s3 = int_to_ptr.vmem [resolvable:$true] %s167_s3 }
  0x36   :  { %183 = vmatpush3.bf16.msra.mxu0 %v75_v4  ;;  %vm157_vm2 = vcmp.ge.u32.totalorder %v156_v44, 1073741824  ;;  %s281_s9 = scalar_lea.vmem %s168_s3, 128  ;;  %p286_p7 = scmp.lt.s32.totalorder %s168_s3, %s168_s3 }
  0x37   :  { %184 = vmatprep.subr.bf16.mxu0 %v315_v0  ;;  %v79_v11 = vsub.s32 0, %v78_v10  ;;  %v144_v36 = vsub.s32 1, %v78_v10  ;;  %v152_v38 = vsub.s32 2, %v78_v10  ;;  %p282_p6 = scmp.ne.s32.totalorder %s168_s3, %s281_s9  ;;  %p287_p8 = scmp.lt.s32.totalorder %s281_s9, %s281_s9 }
  0x39   :  { %v80_v13 = vrot.slane %v76_v12, %v79_v11  ;;  %v145_v37 = vrot.slane %v76_v12, %v144_v36  ;;  %v153_v40 = vrot.slane %v76_v12, %v152_v38  ;;  %p288_p9 = por %p287_p8, %p286_p7 }
  0x3a   :  { %185 = vmatpush3.bf16.msra.mxu0 %v74_v6 }
  0x3b   :  { %p289_p10 = pnand %p288_p9, %p282_p6 }
  0x3d   :  { %187 = vmatmul.mubr.msk.bf16.vlgmr.msra.gmra.mxu0 %vm81_vm1, %v69_v8 }
  0xfd   :  { %v119_v14 = vpop.f32.mrf.mxu0 }
  0xfe   :  { %v120_v15 = vadd.f32 %v119_v14, %v80_v13 }
  0xff   :  { %v188_v16 = vpop.f32.mrf.mxu0 }
 0x100   :  { %v125_v17 = vrot.slane %v120_v15, 4 }
 0x101   :  { %v122_v18 = vpop.f32.mrf.mxu0 }
 0x102   :  { %v126_v19 = vadd.f32 %v125_v17, %v120_v15 }
 0x103   :  { %v189_v20 = vpop.f32.mrf.mxu0 }
 0x104   :  { %v127_v21 = vrot.slane %v126_v19, 2 }
 0x106   :  { %v128_v22 = vadd.f32 %v127_v21, %v126_v19 }
 0x108   :  { %v129_v23 = vrot.slane %v128_v22, 1 }
 0x10a   :  { %v130_v24 = vadd.f32 %v129_v23, %v128_v22 }
 0x10c   :  { %v132_v25 = vmul.f32 0.125, %v130_v24 }
 0x10e   :  { %v133_v26 = vsub.f32 %v120_v15, %v132_v25 }
 0x110   :  { %v134_v27 = vmul.f32 %v133_v26, %v133_v26  ;;  %v146_v39 = vmul.f32 %v145_v37, %v133_v26 }
 0x112   :  { %v135_v28 = vrot.slane %v134_v27, 4 }
 0x114   :  { %v136_v29 = vadd.f32 %v135_v28, %v134_v27 }
 0x116   :  { %v137_v30 = vrot.slane %v136_v29, 2 }
 0x118   :  { %v138_v31 = vadd.f32 %v137_v30, %v136_v29 }
 0x11a   :  { %v139_v32 = vrot.slane %v138_v31, 1 }
 0x11c   :  { %v140_v33 = vadd.f32 %v139_v32, %v138_v31 }
 0x11e   :  { %v141_v34 = vmul.f32 0.125, %v140_v33 }
 0x120   :  { %v147_v35 = vadd.f32 1e-05, %v141_v34 }
 0x122   :  { %199 = vrsqrt.f32 %v147_v35 }
 0x12f   :  { %v200_v41 = vpop.eup %199 }
 0x130   :  { %v149_v42 = vmul.f32 %v200_v41, %v146_v39 }
 0x132   :  { %v154_v43 = vadd.f32 %v153_v40, %v149_v42 }
 0x134   :  { %v155_v45 = vmax.f32 %v154_v43, 0.0 }
 0x136   :  { %v158_v46 = vmul.f32 1.3333334, %v155_v45 }
 0x138   :  { %v159_v47 = vsel %vm157_vm2, %v158_v46, 0.0 }
 0x139   :  { %160 = vst [vmem:[#allocation10] sm:$0xff] %v159_v47 }
 0x13a   :  { %292 = shalt.err (!%p289_p10)
}
 0x13b   :  { %170 = dma.vmem_to_hbm [thread:$0]  %s168_s3, 128, %s362_s4, [#allocation4]  }
 0x13c   :  { %307 = dma.done.wait [#allocation4], 128  }
 0x13d   :  { %308 = vsyncadd [#allocation4], 4294967168 }
 0x13e   :  { %174 = vsyncpa [#allocation3], 1 }
 0x13f   :  { %175 = vsyncpa [#allocation6], 1 }
 0x140   :  { %176 = vsyncpa [#allocation9], 1 }
 0x141   :  { %177 = vsyncpa [#allocation4], 1 }

</bundles_post_ra>
